<compile_context>
chip_gen: v7x
topology: tpu7x:2x2x1
jax: 0.10.0
libtpu: 0.0.40
codegen_flags: <defaults>
</compile_context>

<pallas_src>
import jax
import jax.numpy as jnp
from jax.experimental import pallas as pl
from jax.experimental.pallas import tpu as pltpu


def _round_up(x, m):
    return ((x + m - 1) // m) * m


def _psd_probe_kernel(x_ref, p_ref, o_ref):
    # x_ref: (Bt, S8, D)      input representations (f32 or bf16)
    # p_ref: (D, R_pad)       projection matrix (resident; zero-padded columns)
    # o_ref: (Bt, S8, S_col)  squared distances, lane-dense last dim (f32)
    Bt, S8, D = x_ref.shape
    S_col = o_ref.shape[-1]
    R_pad = p_ref.shape[-1]

    x16 = x_ref[...].astype(jnp.bfloat16)
    p16 = p_ref[...].astype(jnp.bfloat16)

    # Projection on the MXU: fold (Bt, S8) into the M dimension, bf16 operands,
    # f32 accumulation.
    t = jnp.dot(x16.reshape(Bt * S8, D), p16,
                preferred_element_type=jnp.float32)          # (Bt*S8, R_pad)
    t = t.reshape(Bt, S8, R_pad)

    # Widen the row axis to S_col so the Gram matmul output (and the store)
    # has a lane-dense (multiple-of-128) last dim. Zero rows add zero columns
    # to the output, which the wrapper slices off.
    if S_col > S8:
        t = jnp.concatenate(
            [t, jnp.zeros((Bt, S_col - S8, R_pad), jnp.float32)], axis=1)

    # Use the bf16-rounded t for BOTH the Gram matmul and the norms so the
    # ||.||^2 terms are consistent with the inner products (less cancellation).
    t16 = t.astype(jnp.bfloat16)                             # (Bt, S_col, R_pad)
    tf = t16.astype(jnp.float32)
    n_all = jnp.sum(tf * tf, axis=-1, keepdims=True)         # (Bt, S_col, 1) f32
    n_i = n_all[:, :S8, :]                                   # (Bt, S8, 1)
    n_j = jnp.swapaxes(n_all, 1, 2)                          # (Bt, 1, S_col)

    # Gram matrix on the MXU (bf16 operands, f32 accumulation).
    gram = jnp.einsum("bir,bjr->bij", t16[:, :S8, :], t16,
                      preferred_element_type=jnp.float32)    # (Bt, S8, S_col)

    # ||t_i - t_j||^2 = n_i + n_j - 2 <t_i, t_j>; clamp tiny negatives.
    sq = jnp.maximum(n_i + n_j - 2.0 * gram, 0.0)

    # Exact zeros on the diagonal, as in the direct-difference formulation.
    row = jax.lax.broadcasted_iota(jnp.int32, (Bt, S8, S_col), 1)
    col = jax.lax.broadcasted_iota(jnp.int32, (Bt, S8, S_col), 2)
    sq = jnp.where(row == col, 0.0, sq)

    o_ref[...] = sq.astype(o_ref.dtype)


def two_word_psd_probe(batch, proj, block_b=None):
    """batch: (B, S, D) [f32 or bf16], proj: (D, R) -> (B, S, S) float32."""
    B, S, D = batch.shape
    D2, R = proj.shape
    assert D == D2, "projection input dim must match representation dim"

    S8 = _round_up(S, 8)        # sublane-aligned row count
    S_col = _round_up(S, 128)   # lane-dense output column count
    R_pad = _round_up(R, 128)   # lane-dense probe rank

    # Zero padding does not change the distances we keep.
    if S8 != S:
        batch = jnp.pad(batch, ((0, 0), (0, S8 - S), (0, 0)))
    if R_pad != R:
        proj = jnp.pad(proj, ((0, 0), (0, R_pad - R)))

    x_bytes = jnp.dtype(batch.dtype).itemsize
    p_bytes = jnp.dtype(proj.dtype).itemsize

    # ---- generation-aware VMEM / block sizing -----------------------------
    try:
        vmem_cap = int(pltpu.get_tpu_info().vmem_capacity_bytes)
    except Exception:
        vmem_cap = 64 * 1024 * 1024  # conservative: v7x per-TensorCore VMEM

    # Per-step working set (bytes): double-buffered in/out tiles, the resident
    # (conservatively double-buffered) proj, and the f32/bf16 intermediates
    # (t, widened t, gram + sq temporaries).
    proj_res = 2 * D * R_pad * p_bytes
    per_bb = (2 * S8 * D * x_bytes            # input tile (x2 buffers)
              + 2 * S8 * S_col * 4            # output tile (x2 buffers)
              + S_col * R_pad * (4 + 2 + 2)   # t f32 + bf16 copies
              + 2 * S8 * S_col * 4)           # gram + sq temporaries

    def working_set(bb):
        return proj_res + bb * per_bb

    budget = min(int(vmem_cap * 0.4), 48 * 1024 * 1024)

    if block_b is None:
        # Largest block fitting the budget, but keep >= 2 grid steps so a
        # two-TensorCore chip can shard the batch axis across cores.
        max_bb = max(1, B // 2) if B >= 2 else 1
        fit = (budget - proj_res) // per_bb if budget > proj_res else 1
        block_b = int(max(1, min(max_bb, fit)))
    block_b = int(max(1, min(block_b, B)))

    grid_b = pl.cdiv(B, block_b)  # non-divisible B -> masked tail block

    vmem_limit = int(min(int(vmem_cap * 0.9),
                         max(32 * 1024 * 1024,
                             working_set(block_b) + (8 << 20))))

    out_padded = pl.pallas_call(
        _psd_probe_kernel,
        out_shape=jax.ShapeDtypeStruct((B, S8, S_col), jnp.float32),
        grid_spec=pltpu.PrefetchScalarGridSpec(
            num_scalar_prefetch=0,
            grid=(grid_b,),
            in_specs=[
                # block_b sentences per grid step
                pl.BlockSpec((block_b, S8, D), lambda b: (b, 0, 0)),
                # projection matrix: same block every step (stays resident)
                pl.BlockSpec((D, R_pad), lambda b: (0, 0)),
            ],
            out_specs=pl.BlockSpec((block_b, S8, S_col), lambda b: (b, 0, 0)),
        ),
        compiler_params=pltpu.CompilerParams(
            dimension_semantics=("parallel",),
            vmem_limit_bytes=vmem_limit,
        ),
    )(batch, proj)

    return out_padded[:, :S, :S]


def reference_psd_probe(batch, proj):
    t = jnp.matmul(batch, proj)                       # (B, S, R)
    diffs = t[:, :, None, :] - t[:, None, :, :]       # (B, S, S, R)
    return jnp.sum(diffs * diffs, axis=-1)            # (B, S, S)


if __name__ == "__main__":
    # Small shapes consistent with the module's forward:
    #   batch_size=2, max_seq_len=8, representation_dim (model_dim)=64,
    #   probe_rank=32 (as in the module).
    B, S, D, R = 2, 8, 64, 32

    key = jax.random.PRNGKey(0)
    k_x, k_p = jax.random.split(key)

    batch = jax.random.normal(k_x, (B, S, D), dtype=jnp.float32)
    # nn.init.uniform_(self.proj, -0.05, 0.05) -> deterministic uniform init
    proj = jax.random.uniform(k_p, (D, R), dtype=jnp.float32,
                              minval=-0.05, maxval=0.05)

    out = two_word_psd_probe(batch, proj)
    out = jax.block_until_ready(out)

    ref = reference_psd_probe(batch, proj)
    assert out.shape == (B, S, S)
    # bf16 MXU operands (f32 accumulation) vs. an all-f32 reference -> loose tol.
    max_err = float(jnp.max(jnp.abs(out - ref)))
    assert jnp.allclose(out, ref, atol=5e-2, rtol=5e-2), (
        f"mismatch vs reference: max abs err {max_err}")

    print("KERNEL_OK")
</pallas_src>

<mosaic_0001>
module attributes {stable_mosaic.version = 11 : i64} {
  func.func @_psd_probe_kernel(%arg0: i32, %arg1: memref<1x8x64xf32, #tpu.memory_space<vmem>>, %arg2: memref<64x128xf32, #tpu.memory_space<vmem>>, %arg3: memref<1x8x128xf32, #tpu.memory_space<vmem>>) attributes {dimension_semantics = [#tpu.dimension_semantics<parallel>], iteration_bounds = array<i64: 2>, scalar_prefetch = 0 : i64, scratch_operands = 0 : i64, tpu.core_type = #tpu.core_type<tc>, window_params = [{transform_indices = @transform_0, window_bounds = array<i64: 1, 8, 64>}, {pipeline_mode = #tpu.pipeline_mode<synchronous>, transform_indices = @transform_1, window_bounds = array<i64: 64, 128>}, {transform_indices = @transform_2, window_bounds = array<i64: 1, 8, 128>}]} {
    %c0 = arith.constant 0 : index
    %c0_0 = arith.constant 0 : index
    %c0_1 = arith.constant 0 : index
    %0 = vector.load %arg1[%c0, %c0_0, %c0_1] : memref<1x8x64xf32, #tpu.memory_space<vmem>>, vector<1x8x64xf32>
    %1 = arith.truncf %0 : vector<1x8x64xf32> to vector<1x8x64xbf16>
    %c0_2 = arith.constant 0 : index
    %c0_3 = arith.constant 0 : index
    %2 = vector.load %arg2[%c0_2, %c0_3] : memref<64x128xf32, #tpu.memory_space<vmem>>, vector<64x128xf32>
    %3 = arith.truncf %2 : vector<64x128xf32> to vector<64x128xbf16>
    %4 = vector.shape_cast %1 : vector<1x8x64xbf16> to vector<8x64xbf16>
    %cst = arith.constant dense<0.000000e+00> : vector<8x128xf32>
    %5 = tpu.matmul %4, %3, %cst {dimension_numbers = #tpu.dot_dimension_numbers<[1], [0], [0], [1], [0, 0, 1, 1], [], []>} : vector<8x64xbf16>, vector<64x128xbf16>, vector<8x128xf32> -> vector<8x128xf32>
    %6 = vector.shape_cast %5 : vector<8x128xf32> to vector<1x8x128xf32>
    %cst_4 = arith.constant 0.000000e+00 : f32
    %7 = vector.broadcast %cst_4 : f32 to vector<1x120x128xf32>
    %8 = tpu.concatenate %6, %7 in 1 : vector<1x8x128xf32>, vector<1x120x128xf32> -> vector<1x128x128xf32>
    %9 = arith.truncf %8 : vector<1x128x128xf32> to vector<1x128x128xbf16>
    %10 = arith.extf %9 : vector<1x128x128xbf16> to vector<1x128x128xf32>
    %11 = arith.mulf %10, %10 : vector<1x128x128xf32>
    %cst_5 = arith.constant dense<0.000000e+00> : vector<1x128xf32>
    %12 = vector.multi_reduction <add>, %11, %cst_5 [2] : vector<1x128x128xf32> to vector<1x128xf32>
    %13 = vector.shape_cast %12 : vector<1x128xf32> to vector<1x128x1xf32>
    %14 = vector.extract_strided_slice %13 {offsets = [0, 0, 0], sizes = [1, 8, 1], strides = [1, 1, 1]} : vector<1x128x1xf32> to vector<1x8x1xf32>
    %15 = tpu.transpose %13, [0, 2, 1] : vector<1x128x1xf32> -> vector<1x1x128xf32>
    %16 = vector.extract_strided_slice %9 {offsets = [0, 0, 0], sizes = [1, 8, 128], strides = [1, 1, 1]} : vector<1x128x128xbf16> to vector<1x8x128xbf16>
    "tpu.trace_start"() <{level = 10 : i32, message = "bir,bjr->bij"}> : () -> ()
    %cst_6 = arith.constant dense<0.000000e+00> : vector<1x8x128xf32>
    %17 = tpu.matmul %16, %9, %cst_6 {dimension_numbers = #tpu.dot_dimension_numbers<[2], [2], [1], [1], [0, 0, 0, 1, 1, 1], [0], [0]>} : vector<1x8x128xbf16>, vector<1x128x128xbf16>, vector<1x8x128xf32> -> vector<1x8x128xf32>
    "tpu.trace_stop"() : () -> ()
    %18 = vector.broadcast %14 : vector<1x8x1xf32> to vector<1x8x128xf32>
    %19 = vector.broadcast %15 : vector<1x1x128xf32> to vector<1x8x128xf32>
    %20 = arith.addf %18, %19 : vector<1x8x128xf32>
    %cst_7 = arith.constant 2.000000e+00 : f32
    %21 = vector.broadcast %cst_7 : f32 to vector<1x8x128xf32>
    %22 = arith.mulf %21, %17 : vector<1x8x128xf32>
    %23 = arith.subf %20, %22 : vector<1x8x128xf32>
    %cst_8 = arith.constant 0.000000e+00 : f32
    %24 = vector.broadcast %cst_8 : f32 to vector<1x8x128xf32>
    %25 = arith.maximumf %23, %24 : vector<1x8x128xf32>
    %26 = tpu.iota {dimensions = array<i32: 1>} : vector<1x8x128xi32>
    %27 = tpu.iota {dimensions = array<i32: 2>} : vector<1x8x128xi32>
    %28 = arith.cmpi eq, %26, %27 : vector<1x8x128xi32>
    %cst_9 = arith.constant 0.000000e+00 : f32
    %29 = vector.broadcast %cst_9 : f32 to vector<1x8x128xf32>
    %30 = arith.select %28, %29, %25 : vector<1x8x128xi1>, vector<1x8x128xf32>
    %c0_10 = arith.constant 0 : index
    %c0_11 = arith.constant 0 : index
    %c0_12 = arith.constant 0 : index
    %31 = vector.load %arg3[%c0_10, %c0_11, %c0_12] : memref<1x8x128xf32, #tpu.memory_space<vmem>>, vector<1x8x128xf32>
    tpu.vector_store %arg3[%c0_10, %c0_11, %c0_12], %30 {strides = array<i32>} : memref<1x8x128xf32, #tpu.memory_space<vmem>>, vector<1x8x128xf32>,
    return
  }
  func.func @transform_0(%arg0: i32) -> (i32, i32, i32) {
    %c0_i32 = arith.constant 0 : i32
    %c0_i32_0 = arith.constant 0 : i32
    %c0_i32_1 = arith.constant 0 : i32
    return %arg0, %c0_i32, %c0_i32_0 : i32, i32, i32
  }
  func.func @transform_1(%arg0: i32) -> (i32, i32) {
    %c0_i32 = arith.constant 0 : i32
    %c0_i32_0 = arith.constant 0 : i32
    %c0_i32_1 = arith.constant 0 : i32
    return %c0_i32, %c0_i32_0 : i32, i32
  }
  func.func @transform_2(%arg0: i32) -> (i32, i32, i32) {
    %c0_i32 = arith.constant 0 : i32
    %c0_i32_0 = arith.constant 0 : i32
    %c0_i32_1 = arith.constant 0 : i32
    return %arg0, %c0_i32, %c0_i32_0 : i32, i32, i32
  }
}

</mosaic_0001>

<bundles_post_ra>
// kernel: tpu_custom_call.1
= control target key start
LH: loop header
LB: loop body
LE: loop exit
PB: predicated region body
PF: predicated region fallthrough
CT: control target
= control target key end

     0   :  { %7 = vsyncpa [#allocation3], 0  ;;  %s887_s0 = inlined_call_operand.hbm [shape: f32[2,8,64], index: 0, kind: input, shape index: {}]   ;;  %s888_s1 = inlined_call_operand.hbm [shape: f32[64,128], index: 1, kind: input, shape index: {}]   ;;  %s889_s2 = inlined_call_operand.hbm [shape: f32[2,8,128], index: 2, kind: output, shape index: {}]  }
   0x1   :  { %9 = vsyncpa [#allocation3 + $0x1], 0 }
   0x2   :  { %10 = vsyncpa [#allocation6], 0 }
   0x3   :  { %11 = vsyncpa [#allocation4], 0 }
   0x4   :  { %13 = vsyncpa [#allocation4 + $0x1], 0  ;;  %s687_s9 = smov 0   ;;  %s689_s10 = smov 0  }
   0x5   :  { %s691_s11 = smov 0   ;;  %s693_s12 = smov 0  }
   0x6 LB: > { %s708_s13 = sadd.s32 4294967295, %s662_s12   ;;  %s432_s14 = sadd.s32 4294967294, %s662_s12   ;;  %s662_s12 = sphi %s693_s12, %s909_s12   ;;  %s658_s11 = sphi %s691_s11, %s908_s11   ;;  %s654_s10 = sphi %s689_s10, %s907_s10   ;;  %s650_s9 = sphi %s687_s9, %s906_s9  }
   0x7   : > { %p39_p0 = scmp.ne.s32.totalorder %s654_s10, %s650_s9  ;;  %p890_p1 = scmp.eq.s32.totalorder %s708_s13, 0 }
   0x8   : > { %p90_p3 = scmp.eq.s32.totalorder %s432_s14, 1  ;;  %p433_p5 = scmp.ge.s32.totalorder %s662_s12, 1 }
   0x9   : > { %p717_p4 = por %p890_p1, %p39_p0  ;;  %p97_p7 = scmp.lt.s32.totalorder %s662_s12, 3 }
   0xa   : > { %p722_p6 = por %p90_p3, %p39_p0  ;;  %s664_s18 = smov [#allocation5]  }
   0xb   : > { %s893_s15 = scalar_select %p717_p4, 1, 0 }
   0xc   : > { %s894_s16 = scalar_select %p722_p6, 1, 0 }
   0xd   : > { %p727_p8 = pnand %p433_p5, %p97_p7  ;;  %s109_s19 = sshll.u32 %s664_s18, 4  ;;  %s731_s19 = int_to_ptr.vmem [resolvable:$true] %s109_s19 }
   0xe   : > { %s743_s21 = sadd.s32 1, %s662_s12   ;;  %s26_s22 = sadd.s32 1, %s658_s11 }
   0xf   : > { %s895_s17 = scalar_select %p727_p8, 1, 0 }
  0x10   : > { %p480_p9 = pneg %p727_p8  ;;  %s23_s23 = ssub.s32 %s662_s12, %s743_s21 }
  0x11   : > { %s534_s26 = scalar_lea.hbm %s888_s1, 1024 }
  0x12   : > { %p738_p11 = pnand %p480_p9, %p890_p1  ;;  %p535_p12 = scmp.ne.s32.totalorder %s888_s1, %s534_s26 }
  0x13   : > { %p541_p5 = scmp.lt.u32.totalorder %s534_s26, %s888_s1 }
  0x14   : > { %p536_p13 = pneg %p738_p11 }
  0x16   : > { %p537_p0 = pnand %p536_p13, %p535_p12 }
  0x18   : > { %p538_p3 = pneg %p537_p0 }
  0x1a   : > { %p543_p7 = pnand %p541_p5, %p538_p3 }
  0x1c   : > { %546 = shalt.err (!%p543_p7)
}
  0x1d   : > { %s547_s3 = scalar_lea.vmem %s731_s19, 1024  ;;  %p555_p2 = scmp.lt.s32.totalorder %s731_s19, %s731_s19 }
  0x1e   : > { %p548_p9 = scmp.ne.s32.totalorder %s731_s19, %s547_s3  ;;  %p556_p6 = scmp.lt.s32.totalorder %s547_s3, %s547_s3 }
  0x20   : > { %p550_p10 = pnand %p548_p9, %p536_p13  ;;  %p557_p4 = por %p556_p6, %p555_p2 }
  0x22   : > { %p551_p1 = pneg %p550_p10 }
  0x24   : > { %p558_p8 = pnand %p557_p4, %p551_p1 }
  0x26   : > { %561 = shalt.err (!%p558_p8)
}
  0x27   : > { %s665_s4 = smov 128   ;;  %s666_s5 = smov 8  }
  0x28   : > { %483 = dma.hbm_to_vmem [thread:$0]  (!%p738_p11), %s888_s1, 1024, %s731_s19, [#allocation6], %s665_s4, %s665_s4, %s666_s5  }
  0x29   : > { %p24_p2 = scmp.eq.s32.totalorder %s23_s23, 0  ;;  %p33_p1 = scmp.ne.s32.totalorder %s658_s11, %s654_s10 }
  0x2a   : > { %p34_p4 = scmp.eq.s32.totalorder %s662_s12, 0  ;;  %p493_p6 = scmp.lt.s32.totalorder %s662_s12, 2 }
  0x2b   : > { %s774_s8 = scalar_select %p24_p2, %s658_s11, %s26_s22  }
  0x2c   : > { %p35_p8 = por %p34_p4, %p33_p1  ;;  %p897_p10 = scmp.eq.s32.totalorder %s708_s13, 1 }
  0x2d   : > { %s123_s18 = sand.u32 1, %s658_s11   ;;  %s437_s24 = sshll.u32 %s662_s12, 7 }
  0x2e   : > { %p778_p12 = por %p897_p10, %p33_p1  ;;  %s436_s25 = sshll.u32 %s123_s18, 3 }
  0x2f   : > { %s787_s27 = scalar_lea.hbm %s887_s0, %s437_s24  ;;  %s127_s19 = scalar_lea.vmem [#allocation2], %s436_s25 }
  0x30   : > { %s134_s22 = sshll.u32 %s127_s19, 4  ;;  %p789_p11 = pnand %p493_p6, %p35_p8  ;;  %s793_s22 = int_to_ptr.vmem [resolvable:$true] %s134_s22 }
  0x31   : > { %s124_s28 = scalar_lea.sflag [#allocation3], %s123_s18  ;;  %s562_s29 = scalar_lea.hbm %s787_s27, 128 }
  0x32   : > { %p563_p13 = scmp.ne.s32.totalorder %s787_s27, %s562_s29  ;;  %p564_p0 = pneg %p789_p11 }
  0x33   : > { %s567_s4 = scalar_lea.hbm %s887_s0, 256  ;;  %p568_p7 = scmp.lt.u32.totalorder %s787_s27, %s887_s0 }
  0x34   : > { %p565_p3 = pnand %p564_p0, %p563_p13  ;;  %p569_p9 = scmp.lt.u32.totalorder %s567_s4, %s562_s29 }
  0x35   : > { %p571_p1 = scmp.lt.u32.totalorder %s562_s29, %s787_s27 }
  0x36   : > { %p566_p5 = pneg %p565_p3  ;;  %p570_p2 = por %p569_p9, %p568_p7 }
  0x38   : > { %p572_p4 = por %p571_p1, %p570_p2 }
  0x3a   : > { %p573_p6 = pnand %p572_p4, %p566_p5 }
  0x3c   : > { %576 = shalt.err (!%p573_p6)
}
  0x3d   : > { %s577_s7 = scalar_lea.vmem %s793_s22, 128  ;;  %s667_s18 = smov [#allocation2]  }
  0x3e   : > { %p578_p8 = scmp.ne.s32.totalorder %s793_s22, %s577_s7  ;;  %s582_s24 = sshll.u32 %s667_s18, 4  ;;  %s583_s24 = int_to_ptr.vmem [resolvable:$false] %s582_s24 }
  0x3f   : > { %s584_s25 = scalar_lea.vmem %s583_s24, 256  ;;  %p585_p3 = scmp.lt.s32.totalorder %s793_s22, %s583_s24 }
  0x40   : > { %p580_p10 = pnand %p578_p8, %p564_p0  ;;  %p586_p7 = scmp.lt.s32.totalorder %s584_s25, %s577_s7 }
  0x42   : > { %p581_p13 = pneg %p580_p10  ;;  %p587_p9 = por %p586_p7, %p585_p3 }
  0x44   : > { %p588_p2 = pnand %p587_p9, %p581_p13 }
  0x46   : > { %591 = shalt.err (!%p588_p2)
}
  0x47   : > { %487 = dma.hbm_to_vmem [thread:$0]  (!%p789_p11), %s787_s27, 128, %s793_s22, %s124_s28  }
  0x48   : > { %p900_p5 = scmp.ne.s32.totalorder %s895_s17, 0 }
  0x49   : > { %s823_s20 = sand.u32 (!%p900_p5), 1, %s654_s10   ;;  %p901_p0 = scmp.ne.s32.totalorder (!%p900_p5), %s893_s15, 0 }
  0x4a   : > { %143 = sbr.rel (%p900_p5) target bundleno = 615 (0x267), region = 28  ;;  %s439_s26 = sshll.u32 (!%p900_p5), %s823_s20, 3 }
  0x4b   : > { %s146_s19 = scalar_lea.sflag (!%p900_p5), [#allocation3], %s823_s20  ;;  %s149_s29 = scalar_lea.vmem (!%p900_p5), [#allocation2], %s439_s26 }
  0x51   : > { %637 = dma.done.wait (%p901_p0), %s146_s19, 128  }
  0x52   : > { %639 = vsyncadd (%p901_p0), %s146_s19, 4294967168  ;;  %p902_p11 = scmp.eq.s32.totalorder %s708_s13, 0 }
  0x54   : > { %641 = dma.done.wait (%p902_p11), [#allocation6], 1024   ;;  %p903_p1 = pmov %p902_p11 }
  0x55   : > { %v668_v0 = vmov 0.0   ;;  %vm669_vm0 = vmmov 0   ;;  %v177_v1 = vld [vmem:[#allocation5] sm:$0xff]  ;;  %v178_v2 = vld [vmem:[#allocation5 + $0x8] sm:$0xff]  ;;  %v179_v3 = vld [vmem:[#allocation5 + $0x10] sm:$0xff]  ;;  %vm189_vm1 = vcmask 523264   ;;  %v323_v35 = vlaneseq }
  0x56   : > { %643 = vsyncadd (%p903_p1), [#allocation6], 4294966272  ;;  %454 = vmatprep.subr.bf16.mxu0 %v668_v0  ;;  %462 = vmatprep.mubr.msk.bf16.mxu0 %vm669_vm0, %v668_v0  ;;  %v185_v4 = vpack.c.bf16 %v178_v2, %v177_v1  ;;  %v180_v5 = vld [vmem:[#allocation5 + $0x18] sm:$0xff]  ;;  %v181_v7 = vld [vmem:[#allocation5 + $0x20] sm:$0xff]  ;;  %v670_v15 = vmov 0.0|0.0   ;;  %s444_s15 = sshll.u32 %s708_s13, 7 }
  0x57   : > { %466 = vmatprep.subr.bf16.mxu1 %v668_v0  ;;  %245 = vadd.xlane.f32.xlu0 %v668_v0  ;;  %v186_v6 = vpack.c.bf16 %v180_v5, %v179_v3  ;;  %v182_v8 = vld [vmem:[#allocation5 + $0x28] sm:$0xff]  ;;  %v183_v10 = vld [vmem:[#allocation5 + $0x30] sm:$0xff]  ;;  %v184_v11 = vld [vmem:[#allocation5 + $0x38] sm:$0xff]  ;;  %v237_v16 = vunpack.c.l.bf16 %v670_v15  ;;  %v238_v17 = vunpack.c.h.bf16 %v670_v15  ;;  %v324_v36 = vshrl.u32 %v323_v35, 7  ;;  %s173_s17 = scalar_lea.vmem [#allocation7], %s439_s26  ;;  %s843_s28 = scalar_lea.hbm %s889_s2, %s444_s15 }
  0x58   : > { %468 = vmatprep.mubr.msk.bf16.mxu1 %vm669_vm0, %v668_v0  ;;  %455 = vmatpush3.bf16.msra.mxu0 %v185_v4  ;;  %v187_v9 = vpack.c.bf16 %v182_v8, %v181_v7  ;;  %v188_v12 = vpack.c.bf16 %v184_v11, %v183_v10  ;;  %v175_v13 = vld [vmem:[%s149_s29] sm:$0xff]  ;;  %v334_v40 = vand.u32 127, %v323_v35  ;;  %s352_s27 = sshll.u32 %s173_s17, 4  ;;  %s339_s30 = scalar_lea.sflag [#allocation4], %s823_s20  ;;  %s845_s27 = int_to_ptr.vmem [resolvable:$true] %s352_s27 }
  0x59   : > { %456 = vmatprep.subr.bf16.mxu0 %v668_v0  ;;  %v176_v14 = vpack.c.bf16 %v175_v13, %v175_v13  ;;  %v241_v18 = vmul.f32 %v237_v16, %v237_v16  ;;  %v242_v19 = vmul.f32 %v238_v17, %v238_v17  ;;  %v325_v37 = vsub.s32 0, %v324_v36  ;;  %s592_s3 = scalar_lea.vmem %s845_s27, 128  ;;  %s671_s13 = smov [#allocation7]  }
  0x5a   : > { %vm335_vm2 = vcmp.eq.s32.totalorder %v324_v36, %v334_v40  ;;  %p593_p4 = scmp.ne.s32.totalorder %s845_s27, %s592_s3  ;;  %s596_s4 = sshll.u32 %s671_s13, 4  ;;  %s597_s4 = int_to_ptr.vmem [resolvable:$false] %s596_s4 }
  0x5b   : > { %247 = vadd.xlane.f32.xlu1 %v241_v18  ;;  %s598_s5 = scalar_lea.vmem %s597_s4, 256  ;;  %p599_p10 = scmp.lt.s32.totalorder %s845_s27, %s597_s4 }
  0x5c   : > { %457 = vmatpush3.bf16.msra.mxu0 %v186_v6  ;;  %p594_p6 = pnand %p593_p4, %p778_p12  ;;  %p600_p13 = scmp.lt.s32.totalorder %s598_s5, %s592_s3 }
  0x5d   : > { %458 = vmatprep.subr.bf16.mxu0 %v668_v0 }
  0x5e   : > { %p595_p8 = pneg %p594_p6  ;;  %p601_p3 = por %p600_p13, %p599_p10 }
  0x5f   : > { %249 = vadd.xlane.f32.xlu1 %v242_v19 }
  0x60   : > { %459 = vmatpush3.bf16.msra.mxu0 %v187_v9  ;;  %p602_p7 = pnand %p601_p3, %p595_p8 }
  0x61   : > { %460 = vmatprep.subr.bf16.mxu0 %v668_v0 }
  0x64   : > { %461 = vmatpush3.bf16.msra.mxu0 %v188_v12 }
  0x67   : > { %463 = vmatmul.mubr.msk.bf16.vlgmr.msra.gmra.mrb[0].mxu0 %vm189_vm1, %v176_v14 }
  0xe4   : > { %v246_v27 = vpop.xlane.xlu0 %245 }
  0xe8   : > { %v248_v29 = vpop.xlane.xlu1 %247 }
  0xec   : > { %v250_v30 = vpop.xlane.xlu1 %249 }
 0x13a   : > { %v227_v20 = vpop.f32.mrb[0].mxu0 }
 0x13b   : > { %v233_v21 = vpack.c.bf16 %v668_v0, %v227_v20  ;;  %v464_v22 = vpop.f32.mrb[1].mxu0 }
 0x13c   : > { %v230_v23 = vpop.f32.mrb[2].mxu0 }
 0x13d   : > { %v465_v24 = vpop.f32.mrb[3].mxu0  ;;  %467 = vmatpush3.bf16.xpose.msra.mxu1 %v233_v21  ;;  %v235_v25 = vunpack.c.l.bf16 %v233_v21 }
 0x13f   : > { %v239_v26 = vmul.f32 %v235_v25, %v235_v25 }
 0x141   : > { %243 = vadd.xlane.f32.xlu0 %v239_v26 }
 0x144   : > { %469 = vmatmul.mubr.bf16.vlgmr.msra.gmra.mrb[0].mxu1 %v233_v21 }
 0x1ce   : > { %v244_v28 = vpop.xlane.xlu0 %243 }
 0x1cf   : > { %251 = vxpose.xlu0.b32.start [1/16] (narrow) %v244_v28, 8 }
 0x1d3   : > { %252 = vxpose.xlu0.b32.cont [2/16] (narrow) %v246_v27, 8 }
 0x1d7   : > { %253 = vxpose.xlu0.b32.cont [3/16] (narrow) %v248_v29, 8 }
 0x1db   : > { %254 = vxpose.xlu0.b32.cont [4/16] (narrow) %v250_v30, 8 }
 0x1df   : > { %255 = vxpose.xlu0.b32.cont [5/16] (narrow) %v248_v29, 8 }
 0x1e3   : > { %256 = vxpose.xlu0.b32.cont [6/16] (narrow) %v250_v30, 8 }
 0x1e7   : > { %257 = vxpose.xlu0.b32.cont [7/16] (narrow) %v248_v29, 8 }
 0x1eb   : > { %258 = vxpose.xlu0.b32.cont [8/16] (narrow) %v250_v30, 8 }
 0x1ef   : > { %259 = vxpose.xlu0.b32.cont [9/16] (narrow) %v248_v29, 8 }
 0x1f3   : > { %260 = vxpose.xlu0.b32.cont [10/16] (narrow) %v250_v30, 8 }
 0x1f7   : > { %261 = vxpose.xlu0.b32.cont [11/16] (narrow) %v248_v29, 8 }
 0x1fb   : > { %262 = vxpose.xlu0.b32.cont [12/16] (narrow) %v250_v30, 8 }
 0x1ff   : > { %263 = vxpose.xlu0.b32.cont [13/16] (narrow) %v248_v29, 8 }
 0x203   : > { %264 = vxpose.xlu0.b32.cont [14/16] (narrow) %v250_v30, 8 }
 0x207   : > { %265 = vxpose.xlu0.b32.cont [15/16] (narrow) %v248_v29, 8 }
 0x20b   : > { %266 = vxpose.xlu0.b32.end [16/16] (narrow) %v250_v30, 8 }
 0x217   : > { %v317_v31 = vpop.f32.mrb[0].mxu1 }
 0x218   : > { %v470_v32 = vpop.f32.mrb[1].mxu1  ;;  %v328_v41 = vmul.f32 2.0, %v317_v31 }
 0x219   : > { %v320_v33 = vpop.f32.mrb[2].mxu1 }
 0x21a   : > { %v471_v34 = vpop.f32.mrb[3].mxu1 }
 0x24f   : > { %v267_v38 = vpop.trf.xlu0 }
 0x250   : > { %v326_v39 = vrot.slane %v267_v38, %v325_v37 }
 0x252   : > { %v327_v42 = vadd.f32 %v326_v39, %v244_v28 }
 0x254   : > { %v329_v43 = vsub.f32 %v327_v42, %v328_v41 }
 0x256   : > { %v330_v44 = vmax.f32 %v329_v43, 0.0 }
 0x258   : > { %v336_v45 = vsel %vm335_vm2, 0.0, %v330_v44 }
 0x259   : > { %337 = vst [vmem:[%s173_s17] sm:$0xff] %v336_v45 }
 0x25a   : > { %605 = shalt.err (!%p602_p7)
}
 0x25b   : > { %s606_s6 = scalar_lea.hbm %s843_s28, 128  ;;  %s610_s24 = scalar_lea.hbm %s889_s2, 256 }
 0x25c   : > { %p607_p9 = scmp.ne.s32.totalorder %s843_s28, %s606_s6  ;;  %p611_p0 = scmp.lt.u32.totalorder %s843_s28, %s889_s2 }
 0x25d   : > { %p612_p11 = scmp.lt.u32.totalorder %s610_s24, %s606_s6  ;;  %p614_p4 = scmp.lt.u32.totalorder %s606_s6, %s843_s28 }
 0x25e   : > { %p608_p2 = pnand %p607_p9, %p778_p12 }
 0x25f   : > { %p613_p1 = por %p612_p11, %p611_p0 }
 0x260   : > { %p609_p5 = pneg %p608_p2 }
 0x261   : > { %p615_p6 = por %p614_p4, %p613_p1 }
 0x263   : > { %p616_p8 = pnand %p615_p6, %p609_p5 }
 0x265   : > { %619 = shalt.err (!%p616_p8)
}
 0x266   : > { %478 = dma.vmem_to_hbm [thread:$0]  (%p778_p12), %s845_s27, 128, %s843_s28, %s339_s30  }
 0x267 PF: > { %s364_s26 = sand.u32 1, %s650_s9   ;;  %p904_p10 = scmp.ne.s32.totalorder %s894_s16, 0 }
 0x268   : > { %p905_p13 = scmp.ge.s32.totalorder %s662_s12, 2  ;;  %s365_s19 = scalar_lea.sflag [#allocation4], %s364_s26 }
 0x26a   : > { %p489_p3 = pnand %p905_p13, %p904_p10 }
 0x26c   : > { %645 = dma.done.wait (!%p489_p3), %s365_s19, 128  }
 0x26d   : > { %647 = vsyncadd (!%p489_p3), %s365_s19, 4294967168  ;;  %p16_p7 = scmp.ge.s32.totalorder %s743_s21, 4   ;;  %s906_s9 = smov %s654_s10 }
 0x26e   : > { %s907_s10 = smov %s658_s11  ;;  %s908_s11 = smov %s774_s8 }
 0x26f   : > { %s909_s12 = smov %s743_s21  ;;  %18 = sbr.rel (!%p16_p7) target bundleno = 6 (0x6), region = 77 }
 0x276   :  { %370 = vsyncpa [#allocation3], 1 }
 0x277   :  { %372 = vsyncpa [#allocation3 + $0x1], 1 }
 0x278   :  { %373 = vsyncpa [#allocation6], 1 }
 0x279   :  { %374 = vsyncpa [#allocation4], 1 }
 0x27a   :  { %376 = vsyncpa [#allocation4 + $0x1], 1 }

</bundles_post_ra>
